<compile_context>
chip_gen: v5e
topology: v5e:2x2
jax: 0.10.0
libtpu: 0.0.40
codegen_flags: <defaults>
</compile_context>

<pallas_src>
import math
import functools

import jax
import jax.numpy as jnp
from jax.experimental import pallas as pl
from jax.experimental.pallas import tpu as pltpu


# -----------------------------------------------------------------------------
# Cache construction (matches Phi3LongRoPEScaledRotaryEmbedding.__init__)
# -----------------------------------------------------------------------------
def _compute_inv_freq(rescale_factors, base, rotary_dim):
    rescale = jnp.asarray(rescale_factors, dtype=jnp.float32)
    exponents = jnp.arange(0, rotary_dim, 2, dtype=jnp.float32) / rotary_dim
    return 1.0 / (rescale * (base ** exponents))


def _compute_cos_sin_cache(max_pos, rescale_factors, mscale, base, rotary_dim):
    inv_freq = _compute_inv_freq(rescale_factors, base, rotary_dim)
    t = jnp.arange(max_pos, dtype=jnp.float32)
    freqs = jnp.einsum("i,j->ij", t, inv_freq)
    cos = jnp.cos(freqs) * mscale
    sin = jnp.sin(freqs) * mscale
    return jnp.concatenate([cos, sin], axis=-1)  # [max_pos, rotary_dim]


def build_long_short_cache(head_size, rotary_dim, max_position_embeddings,
                           original_max_position_embeddings, base,
                           short_factor, long_factor,
                           short_mscale=None, long_mscale=None,
                           dtype=jnp.float32):
    """Standard vLLM layout: row = [cos(half) | sin(half)] (matches the module)."""
    scale = max_position_embeddings / original_max_position_embeddings
    if scale <= 1.0:
        scaling_factor = 1.0
    else:
        scaling_factor = math.sqrt(
            1 + math.log(scale) / math.log(original_max_position_embeddings))
    if short_mscale is None:
        short_mscale = scaling_factor
    if long_mscale is None:
        long_mscale = scaling_factor

    short_cache = _compute_cos_sin_cache(
        original_max_position_embeddings, short_factor, short_mscale,
        base, rotary_dim).astype(dtype)
    long_cache = _compute_cos_sin_cache(
        max_position_embeddings, long_factor, long_mscale,
        base, rotary_dim).astype(dtype)
    return jnp.concatenate([short_cache, long_cache], axis=0)


def pack_cache_for_kernel(long_short_cache, rotary_dim):
    """Pre-bake kernel-ready rows once at init: [cos, cos, -sin, sin].

    The per-call hot path then becomes  gather -> pallas_call  with no extra
    concatenate kernels / HBM round trips.
    """
    half = rotary_dim // 2
    cos = long_short_cache[:, :half]
    sin = long_short_cache[:, half:]
    return jnp.concatenate([cos, cos, -sin, sin], axis=-1)  # [P, 2*rotary_dim]


# -----------------------------------------------------------------------------
# Pallas kernel: full-width neox rotation for a 2-D block of tokens.
#   cs_ref : (tb, 2*rotary_dim)  packed [cos_full | sin_signed] rows
#   q_ref  : (tb, num_q_heads  * head_size)
#   k_ref  : (tb, num_kv_heads * head_size)
# All blocks are dense 2-D (no sublane padding); the store is a single
# lane-dense full-width write per tensor.
# -----------------------------------------------------------------------------
def _rope_kernel(cs_ref, q_ref, k_ref, q_out_ref, k_out_ref, *,
                 rotary_dim, head_size, num_q_heads, num_kv_heads,
                 compute_dtype):
    half = rotary_dim // 2
    cs = cs_ref[...].astype(compute_dtype)
    cos = cs[:, :rotary_dim]          # cos duplicated to full rotary width
    sin = cs[:, rotary_dim:]          # [-sin, sin]  (sign folded in)

    def half_swap(xr):
        # [x2, x1] along lanes (period = rotary_dim).  Pure-jnp rotation:
        # static slices + concat lower cleanly in Mosaic and interpret mode.
        return jnp.concatenate([xr[:, half:], xr[:, :half]], axis=1)

    def apply(x_ref, o_ref, n_heads):
        x = x_ref[...].astype(compute_dtype)   # single upcast (f32 on v5e)
        outs = []
        for h in range(n_heads):               # unrolled at trace time
            base = h * head_size
            xr = x[:, base:base + rotary_dim]
            rot = xr * cos + half_swap(xr) * sin
            outs.append(rot)
            if rotary_dim != head_size:
                # TODO(synk): for rotary_dim < head_size (e.g. head_dim=96) the
                # non-128-aligned lane slices force masked lane ops; the
                # full-width padded-cos/sin + lane-iota select trick from the
                # review would avoid the relayout there.
                outs.append(x[:, base + rotary_dim:base + head_size])
        o_ref[...] = jnp.concatenate(outs, axis=1).astype(o_ref.dtype)

    apply(q_ref, q_out_ref, num_q_heads)
    apply(k_ref, k_out_ref, num_kv_heads)


def _round_up(x, m):
    return ((x + m - 1) // m) * m


# -----------------------------------------------------------------------------
# Forward wrapper (matches Phi3LongRoPEScaledRotaryEmbedding.forward)
# -----------------------------------------------------------------------------
def phi3_longrope_forward(positions, query, key, packed_cache, *,
                          head_size, rotary_dim,
                          original_max_position_embeddings,
                          offsets=None, token_block=512,
                          vmem_budget_bytes=16 * 1024 * 1024,
                          vmem_limit_bytes=32 * 1024 * 1024,
                          compute_dtype=jnp.float32,
                          donate_qk=False):
    num_tokens = positions.shape[0]
    num_q_heads = query.shape[-1] // head_size
    num_kv_heads = key.shape[-1] // head_size

    # ---- position index + cache gather (plain-JAX glue; tiny traffic) -------
    k_orig = original_max_position_embeddings
    long_prompt_offset = (
        jnp.any(positions > k_orig).astype(jnp.float32)
        * jnp.full_like(positions, k_orig).astype(jnp.float32)
    ).astype(positions.dtype)
    idx = positions + long_prompt_offset
    if offsets is not None:
        idx = idx + offsets
    cs = jnp.take(packed_cache, idx, axis=0)   # (T, 2*rotary_dim) kernel-ready

    # ---- token-block selection (honest VMEM accounting; all blocks dense) ---
    q_width = num_q_heads * head_size
    k_width = num_kv_heads * head_size
    cs_width = 2 * rotary_dim
    # inputs + outputs, double-buffered
    bytes_per_token = 2 * (2 * q_width * query.dtype.itemsize
                           + 2 * k_width * key.dtype.itemsize
                           + cs_width * cs.dtype.itemsize)
    tb = max(8, token_block)
    while tb > 8 and tb * bytes_per_token > vmem_budget_bytes:
        tb //= 2
    tb = max(8, (tb // 8) * 8)
    # Keep >=2 grid steps for large token counts so the "parallel" axis can be
    # sharded across TensorCores (v7x has 2 TCs per chip).
    if num_tokens > 256 and num_tokens <= tb:
        tb = _round_up(-(-num_tokens // 2), 8)
    tb = min(tb, _round_up(num_tokens, 8))

    grid = (pl.cdiv(num_tokens, tb),)   # ragged tail handled by block masking

    kernel = functools.partial(
        _rope_kernel, rotary_dim=rotary_dim, head_size=head_size,
        num_q_heads=num_q_heads, num_kv_heads=num_kv_heads,
        compute_dtype=compute_dtype)

    io_aliases = {1: 0, 2: 1} if donate_qk else {}

    q_out, k_out = pl.pallas_call(
        kernel,
        out_shape=(jax.ShapeDtypeStruct(query.shape, query.dtype),
                   jax.ShapeDtypeStruct(key.shape, key.dtype)),
        grid_spec=pltpu.PrefetchScalarGridSpec(
            num_scalar_prefetch=0,
            grid=grid,
            in_specs=[
                pl.BlockSpec((tb, cs_width), lambda i: (i, 0)),
                pl.BlockSpec((tb, q_width), lambda i: (i, 0)),
                pl.BlockSpec((tb, k_width), lambda i: (i, 0)),
            ],
            out_specs=[
                pl.BlockSpec((tb, q_width), lambda i: (i, 0)),
                pl.BlockSpec((tb, k_width), lambda i: (i, 0)),
            ],
        ),
        compiler_params=pltpu.CompilerParams(
            dimension_semantics=("parallel",),
            vmem_limit_bytes=int(vmem_limit_bytes)),
        input_output_aliases=io_aliases,
    )(cs, query, key)

    return q_out, k_out


# -----------------------------------------------------------------------------
# Pure-JAX reference (mirrors the PyTorch forward) for verification
# -----------------------------------------------------------------------------
def _reference_forward(positions, query, key, cache, *, head_size, rotary_dim,
                       original_max):
    q = query.reshape(*query.shape[:-1], -1, head_size)
    kk = key.reshape(*key.shape[:-1], -1, head_size)
    off = (jnp.any(positions > original_max).astype(jnp.float32)
           * jnp.full_like(positions, original_max).astype(jnp.float32)
           ).astype(positions.dtype)
    idx = positions + off
    cos_sin = jnp.take(cache, idx, axis=0)
    cos, sin = jnp.split(cos_sin, 2, axis=-1)
    cos = jnp.tile(cos, (1, 2))[:, None, :]
    sin = jnp.tile(sin, (1, 2))[:, None, :]

    def rotate_neox(x):
        x1 = x[..., : x.shape[-1] // 2]
        x2 = x[..., x.shape[-1] // 2:]
        return jnp.concatenate([-x2, x1], axis=-1)

    def apply(x):
        xr = x[..., :rotary_dim]
        xp = x[..., rotary_dim:]
        xr = xr * cos + rotate_neox(xr) * sin
        return jnp.concatenate([xr, xp], axis=-1)

    return (apply(q).reshape(query.shape), apply(kk).reshape(key.shape))


if __name__ == "__main__":
    # Small deterministic config (lane-friendly head_size)
    head_size = 128
    rotary_dim = 128
    max_position_embeddings = 128
    original_max_position_embeddings = 64
    base = 10000
    num_q_heads = 8
    num_kv_heads = 4
    num_tokens = 40
    dtype = jnp.float32

    half = rotary_dim // 2
    short_factor = [1.0 + 0.01 * i for i in range(half)]
    long_factor = [2.0 + 0.05 * i for i in range(half)]

    cache = build_long_short_cache(
        head_size, rotary_dim, max_position_embeddings,
        original_max_position_embeddings, base,
        short_factor, long_factor, dtype=dtype)
    packed_cache = pack_cache_for_kernel(cache, rotary_dim)   # init-time, once

    key0 = jax.random.PRNGKey(0)
    kp, kq, kk = jax.random.split(key0, 3)
    positions = jax.random.randint(kp, (num_tokens,), 0,
                                   max_position_embeddings, dtype=jnp.int32)
    query = jax.random.normal(kq, (num_tokens, num_q_heads * head_size),
                              dtype=dtype)
    key = jax.random.normal(kk, (num_tokens, num_kv_heads * head_size),
                            dtype=dtype)

    q_ref, k_ref = _reference_forward(
        positions, query, key, cache,
        head_size=head_size, rotary_dim=rotary_dim,
        original_max=original_max_position_embeddings)

    # 1) default (large) token block — single grid step
    q_out, k_out = phi3_longrope_forward(
        positions, query, key, packed_cache,
        head_size=head_size, rotary_dim=rotary_dim,
        original_max_position_embeddings=original_max_position_embeddings)
    jax.block_until_ready((q_out, k_out))
    assert bool(jnp.allclose(q_out, q_ref, atol=1e-5, rtol=1e-5))
    assert bool(jnp.allclose(k_out, k_ref, atol=1e-5, rtol=1e-5))

    # 2) small token block — multi-step grid + masked partial last block
    q_out2, k_out2 = phi3_longrope_forward(
        positions, query, key, packed_cache,
        head_size=head_size, rotary_dim=rotary_dim,
        original_max_position_embeddings=original_max_position_embeddings,
        token_block=16)
    jax.block_until_ready((q_out2, k_out2))
    assert bool(jnp.allclose(q_out2, q_ref, atol=1e-5, rtol=1e-5))
    assert bool(jnp.allclose(k_out2, k_ref, atol=1e-5, rtol=1e-5))

    # 3) token count not a multiple of 8 — exercises ragged write masking
    t3 = 37
    q_ref3, k_ref3 = _reference_forward(
        positions[:t3], query[:t3], key[:t3], cache,
        head_size=head_size, rotary_dim=rotary_dim,
        original_max=original_max_position_embeddings)
    q_out3, k_out3 = phi3_longrope_forward(
        positions[:t3], query[:t3], key[:t3], packed_cache,
        head_size=head_size, rotary_dim=rotary_dim,
        original_max_position_embeddings=original_max_position_embeddings)
    jax.block_until_ready((q_out3, k_out3))
    assert bool(jnp.allclose(q_out3, q_ref3, atol=1e-5, rtol=1e-5))
    assert bool(jnp.allclose(k_out3, k_ref3, atol=1e-5, rtol=1e-5))

    print("KERNEL_OK")
</pallas_src>

<mosaic_0001>
module attributes {stable_mosaic.version = 11 : i64} {
  func.func @_rope_kernel(%arg0: i32, %arg1: memref<40x256xf32, #tpu.memory_space<vmem>>, %arg2: memref<40x1024xf32, #tpu.memory_space<vmem>>, %arg3: memref<40x512xf32, #tpu.memory_space<vmem>>, %arg4: memref<40x1024xf32, #tpu.memory_space<vmem>>, %arg5: memref<40x512xf32, #tpu.memory_space<vmem>>) attributes {dimension_semantics = [#tpu.dimension_semantics<parallel>], iteration_bounds = array<i64: 1>, scalar_prefetch = 0 : i64, scratch_operands = 0 : i64, tpu.core_type = #tpu.core_type<tc>, window_params = [{transform_indices = @transform_0, window_bounds = array<i64: 40, 256>}, {transform_indices = @transform_1, window_bounds = array<i64: 40, 1024>}, {transform_indices = @transform_2, window_bounds = array<i64: 40, 512>}, {transform_indices = @transform_3, window_bounds = array<i64: 40, 1024>}, {transform_indices = @transform_4, window_bounds = array<i64: 40, 512>}]} {
    %c0 = arith.constant 0 : index
    %c0_0 = arith.constant 0 : index
    %0 = vector.load %arg1[%c0, %c0_0] : memref<40x256xf32, #tpu.memory_space<vmem>>, vector<40x256xf32>
    %1 = vector.extract_strided_slice %0 {offsets = [0, 0], sizes = [40, 128], strides = [1, 1]} : vector<40x256xf32> to vector<40x128xf32>
    %2 = vector.extract_strided_slice %0 {offsets = [0, 128], sizes = [40, 128], strides = [1, 1]} : vector<40x256xf32> to vector<40x128xf32>
    %c0_1 = arith.constant 0 : index
    %c0_2 = arith.constant 0 : index
    %3 = vector.load %arg2[%c0_1, %c0_2] : memref<40x1024xf32, #tpu.memory_space<vmem>>, vector<40x1024xf32>
    %4 = vector.extract_strided_slice %3 {offsets = [0, 0], sizes = [40, 128], strides = [1, 1]} : vector<40x1024xf32> to vector<40x128xf32>
    %5 = arith.mulf %4, %1 : vector<40x128xf32>
    %6 = vector.extract_strided_slice %4 {offsets = [0, 64], sizes = [40, 64], strides = [1, 1]} : vector<40x128xf32> to vector<40x64xf32>
    %7 = vector.extract_strided_slice %4 {offsets = [0, 0], sizes = [40, 64], strides = [1, 1]} : vector<40x128xf32> to vector<40x64xf32>
    %8 = tpu.concatenate %6, %7 in 1 : vector<40x64xf32>, vector<40x64xf32> -> vector<40x128xf32>
    %9 = arith.mulf %8, %2 : vector<40x128xf32>
    %10 = arith.addf %5, %9 : vector<40x128xf32>
    %11 = vector.extract_strided_slice %3 {offsets = [0, 128], sizes = [40, 128], strides = [1, 1]} : vector<40x1024xf32> to vector<40x128xf32>
    %12 = arith.mulf %11, %1 : vector<40x128xf32>
    %13 = vector.extract_strided_slice %11 {offsets = [0, 64], sizes = [40, 64], strides = [1, 1]} : vector<40x128xf32> to vector<40x64xf32>
    %14 = vector.extract_strided_slice %11 {offsets = [0, 0], sizes = [40, 64], strides = [1, 1]} : vector<40x128xf32> to vector<40x64xf32>
    %15 = tpu.concatenate %13, %14 in 1 : vector<40x64xf32>, vector<40x64xf32> -> vector<40x128xf32>
    %16 = arith.mulf %15, %2 : vector<40x128xf32>
    %17 = arith.addf %12, %16 : vector<40x128xf32>
    %18 = vector.extract_strided_slice %3 {offsets = [0, 256], sizes = [40, 128], strides = [1, 1]} : vector<40x1024xf32> to vector<40x128xf32>
    %19 = arith.mulf %18, %1 : vector<40x128xf32>
    %20 = vector.extract_strided_slice %18 {offsets = [0, 64], sizes = [40, 64], strides = [1, 1]} : vector<40x128xf32> to vector<40x64xf32>
    %21 = vector.extract_strided_slice %18 {offsets = [0, 0], sizes = [40, 64], strides = [1, 1]} : vector<40x128xf32> to vector<40x64xf32>
    %22 = tpu.concatenate %20, %21 in 1 : vector<40x64xf32>, vector<40x64xf32> -> vector<40x128xf32>
    %23 = arith.mulf %22, %2 : vector<40x128xf32>
    %24 = arith.addf %19, %23 : vector<40x128xf32>
    %25 = vector.extract_strided_slice %3 {offsets = [0, 384], sizes = [40, 128], strides = [1, 1]} : vector<40x1024xf32> to vector<40x128xf32>
    %26 = arith.mulf %25, %1 : vector<40x128xf32>
    %27 = vector.extract_strided_slice %25 {offsets = [0, 64], sizes = [40, 64], strides = [1, 1]} : vector<40x128xf32> to vector<40x64xf32>
    %28 = vector.extract_strided_slice %25 {offsets = [0, 0], sizes = [40, 64], strides = [1, 1]} : vector<40x128xf32> to vector<40x64xf32>
    %29 = tpu.concatenate %27, %28 in 1 : vector<40x64xf32>, vector<40x64xf32> -> vector<40x128xf32>
    %30 = arith.mulf %29, %2 : vector<40x128xf32>
    %31 = arith.addf %26, %30 : vector<40x128xf32>
    %32 = vector.extract_strided_slice %3 {offsets = [0, 512], sizes = [40, 128], strides = [1, 1]} : vector<40x1024xf32> to vector<40x128xf32>
    %33 = arith.mulf %32, %1 : vector<40x128xf32>
    %34 = vector.extract_strided_slice %32 {offsets = [0, 64], sizes = [40, 64], strides = [1, 1]} : vector<40x128xf32> to vector<40x64xf32>
    %35 = vector.extract_strided_slice %32 {offsets = [0, 0], sizes = [40, 64], strides = [1, 1]} : vector<40x128xf32> to vector<40x64xf32>
    %36 = tpu.concatenate %34, %35 in 1 : vector<40x64xf32>, vector<40x64xf32> -> vector<40x128xf32>
    %37 = arith.mulf %36, %2 : vector<40x128xf32>
    %38 = arith.addf %33, %37 : vector<40x128xf32>
    %39 = vector.extract_strided_slice %3 {offsets = [0, 640], sizes = [40, 128], strides = [1, 1]} : vector<40x1024xf32> to vector<40x128xf32>
    %40 = arith.mulf %39, %1 : vector<40x128xf32>
    %41 = vector.extract_strided_slice %39 {offsets = [0, 64], sizes = [40, 64], strides = [1, 1]} : vector<40x128xf32> to vector<40x64xf32>
    %42 = vector.extract_strided_slice %39 {offsets = [0, 0], sizes = [40, 64], strides = [1, 1]} : vector<40x128xf32> to vector<40x64xf32>
    %43 = tpu.concatenate %41, %42 in 1 : vector<40x64xf32>, vector<40x64xf32> -> vector<40x128xf32>
    %44 = arith.mulf %43, %2 : vector<40x128xf32>
    %45 = arith.addf %40, %44 : vector<40x128xf32>
    %46 = vector.extract_strided_slice %3 {offsets = [0, 768], sizes = [40, 128], strides = [1, 1]} : vector<40x1024xf32> to vector<40x128xf32>
    %47 = arith.mulf %46, %1 : vector<40x128xf32>
    %48 = vector.extract_strided_slice %46 {offsets = [0, 64], sizes = [40, 64], strides = [1, 1]} : vector<40x128xf32> to vector<40x64xf32>
    %49 = vector.extract_strided_slice %46 {offsets = [0, 0], sizes = [40, 64], strides = [1, 1]} : vector<40x128xf32> to vector<40x64xf32>
    %50 = tpu.concatenate %48, %49 in 1 : vector<40x64xf32>, vector<40x64xf32> -> vector<40x128xf32>
    %51 = arith.mulf %50, %2 : vector<40x128xf32>
    %52 = arith.addf %47, %51 : vector<40x128xf32>
    %53 = vector.extract_strided_slice %3 {offsets = [0, 896], sizes = [40, 128], strides = [1, 1]} : vector<40x1024xf32> to vector<40x128xf32>
    %54 = arith.mulf %53, %1 : vector<40x128xf32>
    %55 = vector.extract_strided_slice %53 {offsets = [0, 64], sizes = [40, 64], strides = [1, 1]} : vector<40x128xf32> to vector<40x64xf32>
    %56 = vector.extract_strided_slice %53 {offsets = [0, 0], sizes = [40, 64], strides = [1, 1]} : vector<40x128xf32> to vector<40x64xf32>
    %57 = tpu.concatenate %55, %56 in 1 : vector<40x64xf32>, vector<40x64xf32> -> vector<40x128xf32>
    %58 = arith.mulf %57, %2 : vector<40x128xf32>
    %59 = arith.addf %54, %58 : vector<40x128xf32>
    %60 = tpu.concatenate %10, %17, %24, %31, %38, %45, %52, %59 in 1 : vector<40x128xf32>, vector<40x128xf32>, vector<40x128xf32>, vector<40x128xf32>, vector<40x128xf32>, vector<40x128xf32>, vector<40x128xf32>, vector<40x128xf32> -> vector<40x1024xf32>
    %c0_3 = arith.constant 0 : index
    %c0_4 = arith.constant 0 : index
    %61 = vector.load %arg4[%c0_3, %c0_4] : memref<40x1024xf32, #tpu.memory_space<vmem>>, vector<40x1024xf32>
    tpu.vector_store %arg4[%c0_3, %c0_4], %60 {strides = array<i32>} : memref<40x1024xf32, #tpu.memory_space<vmem>>, vector<40x1024xf32>,
    %c0_5 = arith.constant 0 : index
    %c0_6 = arith.constant 0 : index
    %62 = vector.load %arg3[%c0_5, %c0_6] : memref<40x512xf32, #tpu.memory_space<vmem>>, vector<40x512xf32>
    %63 = vector.extract_strided_slice %62 {offsets = [0, 0], sizes = [40, 128], strides = [1, 1]} : vector<40x512xf32> to vector<40x128xf32>
    %64 = arith.mulf %63, %1 : vector<40x128xf32>
    %65 = vector.extract_strided_slice %63 {offsets = [0, 64], sizes = [40, 64], strides = [1, 1]} : vector<40x128xf32> to vector<40x64xf32>
    %66 = vector.extract_strided_slice %63 {offsets = [0, 0], sizes = [40, 64], strides = [1, 1]} : vector<40x128xf32> to vector<40x64xf32>
    %67 = tpu.concatenate %65, %66 in 1 : vector<40x64xf32>, vector<40x64xf32> -> vector<40x128xf32>
    %68 = arith.mulf %67, %2 : vector<40x128xf32>
    %69 = arith.addf %64, %68 : vector<40x128xf32>
    %70 = vector.extract_strided_slice %62 {offsets = [0, 128], sizes = [40, 128], strides = [1, 1]} : vector<40x512xf32> to vector<40x128xf32>
    %71 = arith.mulf %70, %1 : vector<40x128xf32>
    %72 = vector.extract_strided_slice %70 {offsets = [0, 64], sizes = [40, 64], strides = [1, 1]} : vector<40x128xf32> to vector<40x64xf32>
    %73 = vector.extract_strided_slice %70 {offsets = [0, 0], sizes = [40, 64], strides = [1, 1]} : vector<40x128xf32> to vector<40x64xf32>
    %74 = tpu.concatenate %72, %73 in 1 : vector<40x64xf32>, vector<40x64xf32> -> vector<40x128xf32>
    %75 = arith.mulf %74, %2 : vector<40x128xf32>
    %76 = arith.addf %71, %75 : vector<40x128xf32>
    %77 = vector.extract_strided_slice %62 {offsets = [0, 256], sizes = [40, 128], strides = [1, 1]} : vector<40x512xf32> to vector<40x128xf32>
    %78 = arith.mulf %77, %1 : vector<40x128xf32>
    %79 = vector.extract_strided_slice %77 {offsets = [0, 64], sizes = [40, 64], strides = [1, 1]} : vector<40x128xf32> to vector<40x64xf32>
    %80 = vector.extract_strided_slice %77 {offsets = [0, 0], sizes = [40, 64], strides = [1, 1]} : vector<40x128xf32> to vector<40x64xf32>
    %81 = tpu.concatenate %79, %80 in 1 : vector<40x64xf32>, vector<40x64xf32> -> vector<40x128xf32>
    %82 = arith.mulf %81, %2 : vector<40x128xf32>
    %83 = arith.addf %78, %82 : vector<40x128xf32>
    %84 = vector.extract_strided_slice %62 {offsets = [0, 384], sizes = [40, 128], strides = [1, 1]} : vector<40x512xf32> to vector<40x128xf32>
    %85 = arith.mulf %84, %1 : vector<40x128xf32>
    %86 = vector.extract_strided_slice %84 {offsets = [0, 64], sizes = [40, 64], strides = [1, 1]} : vector<40x128xf32> to vector<40x64xf32>
    %87 = vector.extract_strided_slice %84 {offsets = [0, 0], sizes = [40, 64], strides = [1, 1]} : vector<40x128xf32> to vector<40x64xf32>
    %88 = tpu.concatenate %86, %87 in 1 : vector<40x64xf32>, vector<40x64xf32> -> vector<40x128xf32>
    %89 = arith.mulf %88, %2 : vector<40x128xf32>
    %90 = arith.addf %85, %89 : vector<40x128xf32>
    %91 = tpu.concatenate %69, %76, %83, %90 in 1 : vector<40x128xf32>, vector<40x128xf32>, vector<40x128xf32>, vector<40x128xf32> -> vector<40x512xf32>
    %c0_7 = arith.constant 0 : index
    %c0_8 = arith.constant 0 : index
    %92 = vector.load %arg5[%c0_7, %c0_8] : memref<40x512xf32, #tpu.memory_space<vmem>>, vector<40x512xf32>
    tpu.vector_store %arg5[%c0_7, %c0_8], %91 {strides = array<i32>} : memref<40x512xf32, #tpu.memory_space<vmem>>, vector<40x512xf32>,
    return
  }
  func.func @transform_0(%arg0: i32) -> (i32, i32) {
    %c0_i32 = arith.constant 0 : i32
    %c0_i32_0 = arith.constant 0 : i32
    return %arg0, %c0_i32 : i32, i32
  }
  func.func @transform_1(%arg0: i32) -> (i32, i32) {
    %c0_i32 = arith.constant 0 : i32
    %c0_i32_0 = arith.constant 0 : i32
    return %arg0, %c0_i32 : i32, i32
  }
  func.func @transform_2(%arg0: i32) -> (i32, i32) {
    %c0_i32 = arith.constant 0 : i32
    %c0_i32_0 = arith.constant 0 : i32
    return %arg0, %c0_i32 : i32, i32
  }
  func.func @transform_3(%arg0: i32) -> (i32, i32) {
    %c0_i32 = arith.constant 0 : i32
    %c0_i32_0 = arith.constant 0 : i32
    return %arg0, %c0_i32 : i32, i32
  }
  func.func @transform_4(%arg0: i32) -> (i32, i32) {
    %c0_i32 = arith.constant 0 : i32
    %c0_i32_0 = arith.constant 0 : i32
    return %arg0, %c0_i32 : i32, i32
  }
}

</mosaic_0001>

<bundles_post_ra>
// kernel: tpu_custom_call.1
= control target key start
LH: loop header
LB: loop body
LE: loop exit
PB: predicated region body
PF: predicated region fallthrough
CT: control target
= control target key end

     0   :  { %10 = vsyncpa [#allocation3], 0  ;;  %s1295_s0 = inlined_call_operand.hbm [shape: f32[40,256], index: 0, kind: input, shape index: {}]   ;;  %s1296_s1 = inlined_call_operand.hbm [shape: f32[40,1024], index: 1, kind: input, shape index: {}]   ;;  %s1297_s2 = inlined_call_operand.hbm [shape: f32[40,512], index: 2, kind: input, shape index: {}]   ;;  %s1298_s3 = inlined_call_operand.hbm [shape: f32[40,1024], index: 3, kind: output, shape index: {0}]   ;;  %s1299_s4 = inlined_call_operand.hbm [shape: f32[40,512], index: 4, kind: output, shape index: {1}]  }
   0x1   :  { %11 = vsyncpa [#allocation6], 0 }
   0x2   :  { %12 = vsyncpa [#allocation4], 0  ;;  %s31_s17 = sshll.u32 %s1296_s1, 4  ;;  %s32_s17 = int_to_ptr.hbm [resolvable:$true] %s31_s17 }
   0x3   :  { %13 = vsyncpa [#allocation10], 0  ;;  %s792_s18 = smov [#allocation5]   ;;  %s18_s22 = sshll.u32 %s1295_s0, 4  ;;  %s19_s22 = int_to_ptr.hbm [resolvable:$true] %s18_s22 }
   0x4   :  { %s33_s19 = sshll.u32 %s792_s18, 4  ;;  %s793_s23 = smov 1024   ;;  %s34_s19 = int_to_ptr.vmem [resolvable:$true] %s33_s19 }
   0x5   :  { %s794_s24 = smov 64   ;;  %s795_s25 = smov [#allocation2]  }
   0x6   :  { %39 = dma.hbm_to_vmem [thread:$0]  %s32_s17, 5120, %s34_s19, [#allocation6], %s793_s23, %s793_s23, %s794_s24  }
   0x7   :  { %s20_s26 = sshll.u32 %s795_s25, 4  ;;  %s796_s1 = smov 256   ;;  %s21_s26 = int_to_ptr.vmem [resolvable:$true] %s20_s26 }
   0x8   :  { %s797_s27 = smov 16   ;;  %s44_s30 = sshll.u32 %s1297_s2, 4  ;;  %s45_s30 = int_to_ptr.hbm [resolvable:$true] %s44_s30 }
   0x9   :  { %26 = dma.hbm_to_vmem [thread:$0]  %s19_s22, 1280, %s21_s26, [#allocation3], %s796_s1, %s796_s1, %s797_s27  }
   0xa   :  { %s798_s5 = smov [#allocation7]   ;;  %s799_s6 = smov 512  }
   0xb   :  { %s46_s0 = sshll.u32 %s798_s5, 4  ;;  %s800_s7 = smov 32   ;;  %s47_s0 = int_to_ptr.vmem [resolvable:$true] %s46_s0 }
   0xc   :  { %52 = dma.hbm_to_vmem [thread:$0]  %s45_s30, 2560, %s47_s0, [#allocation6], %s799_s6, %s799_s6, %s800_s7  }
   0xd   :  { %784 = dma.done.wait [#allocation3], 1280  }
   0xe   :  { %785 = vsyncadd [#allocation3], 4294966016 }
   0xf   :  { %786 = dma.done.wait [#allocation6], 7680  }
  0x10   :  { %787 = vsyncadd [#allocation6], 4294959616  ;;  %v843_v0 = vld [vmem:[#allocation5 + $0x80] sm:$0xff]  ;;  %v863_v5 = vld [vmem:[#allocation5 + $0x8] sm:$0xff]  ;;  %s801_s2 = smov [#allocation8]   ;;  %s621_s11 = sshll.u32 %s1298_s3, 4  ;;  %s622_s11 = int_to_ptr.hbm [resolvable:$true] %s621_s11 }
  0x11   :  { %v845_v1 = vld [vmem:[#allocation5] sm:$0xff]  ;;  %129 = vrot.lane.b32.xlu1 %v843_v0, %s794_s24  ;;  %v867_v6 = vld [vmem:[#allocation5 + $0x88] sm:$0xff]  ;;  %v879_v9 = vld [vmem:[#allocation5 + $0x10] sm:$0xff]  ;;  %s619_s8 = sshll.u32 %s801_s2, 4  ;;  %s802_s3 = smov [#allocation9]   ;;  %s620_s8 = int_to_ptr.vmem [resolvable:$true] %s619_s8 }
  0x12   :  { %125 = vrot.lane.b32.xlu0 %v845_v1, %s794_s24  ;;  %v851_v2 = vld [vmem:[#allocation5 + $0x100] sm:$0xff]  ;;  %v869_v7 = vld [vmem:[#allocation5 + $0x48] sm:$0xff]  ;;  %v887_v11 = vld [vmem:[#allocation5 + $0x50] sm:$0xff]  ;;  %s632_s12 = sshll.u32 %s802_s3, 4  ;;  %s634_s15 = sshll.u32 %s1299_s4, 4  ;;  %s633_s12 = int_to_ptr.vmem [resolvable:$true] %s632_s12  ;;  %s635_s15 = int_to_ptr.hbm [resolvable:$true] %s634_s15 }
  0x13   :  { %133 = vrot.lane.b32.xlu2 %v851_v2, %s794_s24  ;;  %v855_v3 = vld [vmem:[#allocation5 + $0xc0] sm:$0xff]  ;;  %v875_v8 = vld [vmem:[#allocation5 + $0xc8] sm:$0xff]  ;;  %v891_v12 = vld [vmem:[#allocation5 + $0xd0] sm:$0xff] }
  0x14   :  { %v857_v4 = vld [vmem:[#allocation5 + $0x40] sm:$0xff]  ;;  %v881_v10 = vld [vmem:[#allocation5 + $0x108] sm:$0xff]  ;;  %v893_v13 = vld [vmem:[#allocation5 + $0x90] sm:$0xff] }
  0x15   :  { %v899_v14 = vld [vmem:[#allocation5 + $0x110] sm:$0xff]  ;;  %v903_v15 = vld [vmem:[#allocation5 + $0x58] sm:$0xff]  ;;  %v923_v20 = vld [vmem:[#allocation5 + $0x20] sm:$0xff] }
  0x16   :  { %v905_v16 = vld [vmem:[#allocation5 + $0x18] sm:$0xff]  ;;  %v927_v21 = vld [vmem:[#allocation5 + $0xa0] sm:$0xff]  ;;  %v939_v24 = vld [vmem:[#allocation5 + $0x28] sm:$0xff] }
  0x17   :  { %v911_v17 = vld [vmem:[#allocation5 + $0x98] sm:$0xff]  ;;  %v929_v22 = vld [vmem:[#allocation5 + $0x60] sm:$0xff]  ;;  %v947_v26 = vld [vmem:[#allocation5 + $0x68] sm:$0xff] }
  0x18   :  { %v915_v18 = vld [vmem:[#allocation5 + $0x118] sm:$0xff]  ;;  %v935_v23 = vld [vmem:[#allocation5 + $0xe0] sm:$0xff]  ;;  %v951_v27 = vld [vmem:[#allocation5 + $0xe8] sm:$0xff] }
  0x19   :  { %131 = vrot.lane.b32.xlu1 %v855_v3, %s794_s24  ;;  %v917_v19 = vld [vmem:[#allocation5 + $0xd8] sm:$0xff]  ;;  %v941_v25 = vld [vmem:[#allocation5 + $0x120] sm:$0xff]  ;;  %v953_v28 = vld [vmem:[#allocation5 + $0xa8] sm:$0xff] }
  0x1a   :  { %127 = vrot.lane.b32.xlu0 %v857_v4, %s794_s24  ;;  %v959_v29 = vld [vmem:[#allocation5 + $0x128] sm:$0xff]  ;;  %v963_v30 = vld [vmem:[#allocation5 + $0x70] sm:$0xff]  ;;  %v983_v35 = vld [vmem:[#allocation5 + $0x38] sm:$0xff] }
  0x1b   :  { %160 = vrot.lane.b32.xlu2 %v863_v5, %s794_s24  ;;  %v965_v31 = vld [vmem:[#allocation5 + $0x30] sm:$0xff]  ;;  %v989_v37 = vld [vmem:[#allocation2 + $0x48] sm:$0xff]  ;;  %v1010_v47 = vld [vmem:[#allocation7] sm:$0xff] }
  0x1c   :  { %v971_v32 = vld [vmem:[#allocation5 + $0xb0] sm:$0xff]  ;;  %v993_v39 = vld [vmem:[#allocation5 + $0xb8] sm:$0xff]  ;;  %v1021_v53 = vld [vmem:[#allocation7 + $0x20] sm:$0xff] }
  0x1d   :  { %v975_v33 = vld [vmem:[#allocation5 + $0x130] sm:$0xff]  ;;  %v995_v40 = vld [vmem:[#allocation5 + $0x78] sm:$0xff]  ;;  %v1023_v54 = vld [vmem:[#allocation2 + $0x30] sm:$0xff] }
  0x1e   :  { %v977_v34 = vld [vmem:[#allocation5 + $0xf0] sm:$0xff]  ;;  %v1002_v44 = vld [vmem:[#allocation5 + $0xf8] sm:$0xff]  ;;  %v153_v55 = vmul.f32 %v875_v8, %v1023_v54  ;;  %v1029_v56 = vld [vmem:[#allocation7 + $0x60] sm:$0xff] }
  0x1f   :  { %v985_v36 = vld [vmem:[#allocation2 + $0x40] sm:$0xff]  ;;  %v1012_v48 = vld [vmem:[#allocation5 + $0x138] sm:$0xff]  ;;  %v1031_v57 = vld [vmem:[#allocation7 + $0x40] sm:$0xff] }
  0x20   :  { %v119_v38 = vmul.f32 %v851_v2, %v985_v36  ;;  %v1004_v45 = vld [vmem:[#allocation2] sm:$0xff]  ;;  %v1014_v49 = vld [vmem:[#allocation2 + $0x8] sm:$0xff]  ;;  %v1033_v58 = vld [vmem:[#allocation2 + $0x38] sm:$0xff] }
  0x21   :  { %164 = vrot.lane.b32.xlu1 %v867_v6, %s794_s24  ;;  %v150_v46 = vmul.f32 %v863_v5, %v1004_v45  ;;  %v1035_v60 = vld [vmem:[#allocation2 + $0x20] sm:$0xff]  ;;  %v1042_v62 = vld [vmem:[#allocation2 + $0x28] sm:$0xff]  ;;  %v1044_v2 = vld [vmem:[#allocation7 + $0x80] sm:$0xff] }
  0x22   :  { %162 = vrot.lane.b32.xlu0 %v869_v7, %s794_s24  ;;  %v117_v5 = vmul.f32 %v843_v0, %v1035_v60 }
  0x23   :  { %166 = vrot.lane.b32.xlu2 %v875_v8, %s794_s24  ;;  %v115_v8 = vmul.f32 %v845_v1, %v1004_v45  ;;  %v1060_v1 = vld [vmem:[#allocation7 + $0x8] sm:$0xff] }
  0x29   :  { %195 = vrot.lane.b32.xlu1 %v879_v9, %s794_s24 }
  0x2a   :  { %168 = vrot.lane.b32.xlu0 %v881_v10, %s794_s24 }
  0x2b   :  { %197 = vrot.lane.b32.xlu2 %v887_v11, %s794_s24 }
  0x31   :  { %201 = vrot.lane.b32.xlu1 %v891_v12, %s794_s24 }
  0x32   :  { %199 = vrot.lane.b32.xlu0 %v893_v13, %s794_s24 }
  0x33   :  { %203 = vrot.lane.b32.xlu2 %v899_v14, %s794_s24 }
  0x39   :  { %232 = vrot.lane.b32.xlu1 %v903_v15, %s794_s24 }
  0x3a   :  { %230 = vrot.lane.b32.xlu0 %v905_v16, %s794_s24 }
  0x3b   :  { %234 = vrot.lane.b32.xlu2 %v911_v17, %s794_s24 }
  0x41   :  { %238 = vrot.lane.b32.xlu1 %v915_v18, %s794_s24 }
  0x42   :  { %236 = vrot.lane.b32.xlu0 %v917_v19, %s794_s24 }
  0x43   :  { %265 = vrot.lane.b32.xlu2 %v923_v20, %s794_s24 }
  0x49   :  { %269 = vrot.lane.b32.xlu1 %v927_v21, %s794_s24 }
  0x4a   :  { %267 = vrot.lane.b32.xlu0 %v929_v22, %s794_s24 }
  0x4b   :  { %271 = vrot.lane.b32.xlu2 %v935_v23, %s794_s24 }
  0x51   :  { %300 = vrot.lane.b32.xlu1 %v939_v24, %s794_s24 }
  0x52   :  { %273 = vrot.lane.b32.xlu0 %v941_v25, %s794_s24 }
  0x53   :  { %302 = vrot.lane.b32.xlu2 %v947_v26, %s794_s24 }
  0x59   :  { %306 = vrot.lane.b32.xlu1 %v951_v27, %s794_s24 }
  0x5a   :  { %304 = vrot.lane.b32.xlu0 %v953_v28, %s794_s24 }
  0x5b   :  { %308 = vrot.lane.b32.xlu2 %v959_v29, %s794_s24 }
  0x61   :  { %337 = vrot.lane.b32.xlu1 %v963_v30, %s794_s24 }
  0x62   :  { %335 = vrot.lane.b32.xlu0 %v965_v31, %s794_s24 }
  0x63   :  { %339 = vrot.lane.b32.xlu2 %v971_v32, %s794_s24 }
  0x69   :  { %343 = vrot.lane.b32.xlu1 %v975_v33, %s794_s24 }
  0x6a   :  { %341 = vrot.lane.b32.xlu0 %v977_v34, %s794_s24 }
  0x6b   :  { %370 = vrot.lane.b32.xlu2 %v983_v35, %s794_s24 }
  0x6d   :  { %v134_v41 = vpop.permute.xlu2 %133 }
  0x6e   :  { %v144_v42 = vmul.f32 %v134_v41, %v989_v37 }
  0x70   :  { %v149_v43 = vadd.f32 %v144_v42, %v119_v38  ;;  %v1050_v42 = vld [vmem:[#allocation2 + $0x10] sm:$0xff] }
  0x71   :  { %374 = vrot.lane.b32.xlu1 %v993_v39, %s794_s24 }
  0x72   :  { %372 = vrot.lane.b32.xlu0 %v995_v40, %s794_s24  ;;  %427 = vst [vmem:[#allocation8 + $0x100] sm:$0xff] %v149_v43 }
  0x73   :  { %376 = vrot.lane.b32.xlu2 %v1002_v44, %s794_s24 }
  0x75   :  { %v161_v50 = vpop.permute.xlu2 %160 }
  0x76   :  { %v175_v51 = vmul.f32 %v161_v50, %v1014_v49  ;;  %v186_v50 = vmul.f32 %v887_v11, %v1050_v42 }
  0x78   :  { %v180_v52 = vadd.f32 %v175_v51, %v150_v46 }
  0x79   :  { %465 = vrot.lane.b32.xlu1 %v1010_v47, %s794_s24 }
  0x7a   :  { %378 = vrot.lane.b32.xlu0 %v1012_v48, %s794_s24  ;;  %396 = vst [vmem:[#allocation8 + $0x8] sm:$0xff] %v180_v52  ;;  %v1058_v52 = vld [vmem:[#allocation7 + $0x28] sm:$0xff] }
  0x7b   :  { %467 = vrot.lane.b32.xlu2 %v1021_v53, %s794_s24 }
  0x7d   :  { %v167_v59 = vpop.permute.xlu2 %166 }
  0x7e   :  { %v178_v61 = vmul.f32 %v167_v59, %v1033_v58 }
  0x80   :  { %v183_v63 = vadd.f32 %v178_v61, %v153_v55  ;;  %v1062_v55 = vld [vmem:[#allocation2 + $0x18] sm:$0xff] }
  0x81   :  { %471 = vrot.lane.b32.xlu1 %v1029_v56, %s794_s24 }
  0x82   :  { %469 = vrot.lane.b32.xlu0 %v1031_v57, %s794_s24  ;;  %420 = vst [vmem:[#allocation8 + $0xc8] sm:$0xff] %v183_v63  ;;  %v1069_v63 = vld [vmem:[#allocation7 + $0x48] sm:$0xff] }
  0x83   :  { %v130_v38 = vpop.permute.xlu1 %129  ;;  %473 = vrot.lane.b32.xlu2 %v1044_v2, %s794_s24 }
  0x84   :  { %v126_v41 = vpop.permute.xlu0 %125  ;;  %v142_v43 = vmul.f32 %v130_v38, %v1042_v62 }
  0x85   :  { %v140_v46 = vmul.f32 %v126_v41, %v1014_v49  ;;  %v198_v59 = vpop.permute.xlu2 %197 }
  0x86   :  { %v147_v51 = vadd.f32 %v142_v43, %v117_v5  ;;  %v211_v61 = vmul.f32 %v198_v59, %v1062_v55  ;;  %v118_v5 = vmul.f32 %v855_v3, %v1023_v54  ;;  %v1081_v59 = vld [vmem:[#allocation7 + $0x88] sm:$0xff] }
  0x87   :  { %v145_v0 = vadd.f32 %v140_v46, %v115_v8  ;;  %v116_v8 = vmul.f32 %v857_v4, %v1050_v42  ;;  %v1083_v3 = vld [vmem:[#allocation7 + $0x68] sm:$0xff] }
  0x88   :  { %411 = vst [vmem:[#allocation8 + $0x80] sm:$0xff] %v147_v51  ;;  %v216_v11 = vadd.f32 %v211_v61, %v186_v50  ;;  %v189_v50 = vmul.f32 %v899_v14, %v985_v36  ;;  %v152_v14 = vmul.f32 %v867_v6, %v1035_v60  ;;  %v1104_v6 = vld [vmem:[#allocation7 + $0x30] sm:$0xff] }
  0x89   :  { %395 = vst [vmem:[#allocation8] sm:$0xff] %v145_v0  ;;  %502 = vrot.lane.b32.xlu1 %v1058_v52, %s794_s24 }
  0x8a   :  { %500 = vrot.lane.b32.xlu0 %v1060_v1, %s794_s24  ;;  %405 = vst [vmem:[#allocation8 + $0x50] sm:$0xff] %v216_v11 }
  0x8b   :  { %v132_v38 = vpop.permute.xlu1 %131  ;;  %504 = vrot.lane.b32.xlu2 %v1069_v63, %s794_s24 }
  0x8c   :  { %v128_v41 = vpop.permute.xlu0 %127  ;;  %v143_v43 = vmul.f32 %v132_v38, %v1033_v58  ;;  %v1090_v38 = vld [vmem:[#allocation7 + $0x10] sm:$0xff] }
  0x8d   :  { %v141_v46 = vmul.f32 %v128_v41, %v1062_v55  ;;  %v204_v4 = vpop.permute.xlu2 %203 }
  0x8e   :  { %v148_v51 = vadd.f32 %v143_v43, %v118_v5  ;;  %v214_v61 = vmul.f32 %v204_v4, %v989_v37  ;;  %v151_v5 = vmul.f32 %v869_v7, %v1050_v42  ;;  %v1102_v4 = vld [vmem:[#allocation7 + $0x50] sm:$0xff] }
  0x8f   :  { %v146_v0 = vadd.f32 %v141_v46, %v116_v8 }
  0x90   :  { %419 = vst [vmem:[#allocation8 + $0xc0] sm:$0xff] %v148_v51  ;;  %v219_v11 = vadd.f32 %v214_v61, %v189_v50  ;;  %v222_v50 = vmul.f32 %v911_v17, %v1035_v60  ;;  %v185_v17 = vmul.f32 %v879_v9, %v1004_v45  ;;  %v1125_v9 = vld [vmem:[#allocation7 + $0x90] sm:$0xff] }
  0x91   :  { %403 = vst [vmem:[#allocation8 + $0x40] sm:$0xff] %v146_v0  ;;  %508 = vrot.lane.b32.xlu1 %v1081_v59, %s794_s24 }
  0x92   :  { %506 = vrot.lane.b32.xlu0 %v1083_v3, %s794_s24  ;;  %429 = vst [vmem:[#allocation8 + $0x110] sm:$0xff] %v219_v11 }
  0x93   :  { %v165_v8 = vpop.permute.xlu1 %164  ;;  %535 = vrot.lane.b32.xlu2 %v1090_v38, %s794_s24 }
  0x94   :  { %v163_v41 = vpop.permute.xlu0 %162  ;;  %v177_v43 = vmul.f32 %v165_v8, %v1042_v62  ;;  %v1111_v8 = vld [vmem:[#allocation7 + $0x70] sm:$0xff] }
  0x95   :  { %v176_v46 = vmul.f32 %v163_v41, %v1062_v55  ;;  %v235_v7 = vpop.permute.xlu2 %234 }
  0x96   :  { %v182_v51 = vadd.f32 %v177_v43, %v152_v14  ;;  %v247_v61 = vmul.f32 %v235_v7, %v1042_v62  ;;  %v154_v14 = vmul.f32 %v881_v10, %v985_v36  ;;  %v1123_v7 = vld [vmem:[#allocation7 + $0x18] sm:$0xff] }
  0x97   :  { %v181_v0 = vadd.f32 %v176_v46, %v151_v5 }
  0x98   :  { %412 = vst [vmem:[#allocation8 + $0x88] sm:$0xff] %v182_v51  ;;  %v252_v11 = vadd.f32 %v247_v61, %v222_v50  ;;  %v255_v50 = vmul.f32 %v923_v20, %v1004_v45  ;;  %v188_v20 = vmul.f32 %v891_v12, %v1023_v54  ;;  %v1146_v12 = vld [vmem:[#allocation7 + $0x58] sm:$0xff] }
  0x99   :  { %404 = vst [vmem:[#allocation8 + $0x48] sm:$0xff] %v181_v0  ;;  %539 = vrot.lane.b32.xlu1 %v1102_v4, %s794_s24 }
  0x9a   :  { %537 = vrot.lane.b32.xlu0 %v1104_v6, %s794_s24  ;;  %414 = vst [vmem:[#allocation8 + $0x98] sm:$0xff] %v252_v11 }
  0x9b   :  { %v196_v5 = vpop.permute.xlu1 %195  ;;  %541 = vrot.lane.b32.xlu2 %v1111_v8, %s794_s24  ;;  %1301 = vst [vmem:[#allocation15_spill] sm:$0xff] %v1146_v12 }
  0x9c   :  { %v169_v41 = vpop.permute.xlu0 %168  ;;  %v210_v43 = vmul.f32 %v196_v5, %v1014_v49  ;;  %v1132_v5 = vld [vmem:[#allocation7 + $0x38] sm:$0xff] }
  0x9d   :  { %v179_v46 = vmul.f32 %v169_v41, %v989_v37  ;;  %v266_v10 = vpop.permute.xlu2 %265 }
  0x9e   :  { %v215_v51 = vadd.f32 %v210_v43, %v185_v17  ;;  %v280_v61 = vmul.f32 %v266_v10, %v1014_v49  ;;  %v187_v17 = vmul.f32 %v893_v13, %v1035_v60  ;;  %v1144_v10 = vld [vmem:[#allocation7 + $0x78] sm:$0xff] }
  0x9f   :  { %v184_v0 = vadd.f32 %v179_v46, %v154_v14 }
  0xa0   :  { %397 = vst [vmem:[#allocation8 + $0x10] sm:$0xff] %v215_v51  ;;  %v285_v11 = vadd.f32 %v280_v61, %v255_v50  ;;  %v258_v50 = vmul.f32 %v935_v23, %v1023_v54  ;;  %v221_v23 = vmul.f32 %v903_v15, %v1050_v42 }
  0xa1   :  { %428 = vst [vmem:[#allocation8 + $0x108] sm:$0xff] %v184_v0  ;;  %570 = vrot.lane.b32.xlu1 %v1123_v7, %s794_s24 }
  0xa2   :  { %543 = vrot.lane.b32.xlu0 %v1125_v9, %s794_s24  ;;  %399 = vst [vmem:[#allocation8 + $0x20] sm:$0xff] %v285_v11 }
  0xa3   :  { %v202_v14 = vpop.permute.xlu1 %201  ;;  %572 = vrot.lane.b32.xlu2 %v1132_v5, %s794_s24 }
  0xa4   :  { %v200_v41 = vpop.permute.xlu0 %199  ;;  %v213_v43 = vmul.f32 %v202_v14, %v1033_v58  ;;  %v1153_v14 = vld [vmem:[#allocation7 + $0x98] sm:$0xff] }
  0xa5   :  { %v212_v46 = vmul.f32 %v200_v41, %v1042_v62  ;;  %v272_v13 = vpop.permute.xlu2 %271 }
  0xa6   :  { %v218_v51 = vadd.f32 %v213_v43, %v188_v20  ;;  %v283_v61 = vmul.f32 %v272_v13, %v1033_v58  ;;  %v220_v20 = vmul.f32 %v905_v16, %v1004_v45 }
  0xa7   :  { %v217_v0 = vadd.f32 %v212_v46, %v187_v17 }
  0xa8   :  { %421 = vst [vmem:[#allocation8 + $0xd0] sm:$0xff] %v218_v51  ;;  %v288_v11 = vadd.f32 %v283_v61, %v258_v50  ;;  %v291_v50 = vmul.f32 %v947_v26, %v1050_v42  ;;  %v224_v61 = vmul.f32 %v915_v18, %v985_v36 }
  0xa9   :  { %413 = vst [vmem:[#allocation8 + $0x90] sm:$0xff] %v217_v0  ;;  %576 = vrot.lane.b32.xlu1 %v1144_v10, %s794_s24 }
  0xaa   :  { %574 = vrot.lane.b32.xlu0 %v1146_v12, %s794_s24  ;;  %423 = vst [vmem:[#allocation8 + $0xe0] sm:$0xff] %v288_v11  ;;  %v223_v11 = vmul.f32 %v917_v19, %v1023_v54  ;;  %v257_v19 = vmul.f32 %v927_v21, %v1035_v60 }
  0xab   :  { %v233_v17 = vpop.permute.xlu1 %232  ;;  %578 = vrot.lane.b32.xlu2 %v1153_v14, %s794_s24 }
  0xac   :  { %v231_v41 = vpop.permute.xlu0 %230  ;;  %v246_v43 = vmul.f32 %v233_v17, %v1062_v55 }
  0xad   :  { %v245_v46 = vmul.f32 %v231_v41, %v1014_v49  ;;  %v303_v13 = vpop.permute.xlu2 %302 }
  0xae   :  { %v251_v51 = vadd.f32 %v246_v43, %v221_v23  ;;  %v316_v15 = vmul.f32 %v303_v13, %v1062_v55  ;;  %v294_v23 = vmul.f32 %v959_v29, %v985_v36 }
  0xaf   :  { %v250_v0 = vadd.f32 %v245_v46, %v220_v20 }
  0xb0   :  { %406 = vst [vmem:[#allocation8 + $0x58] sm:$0xff] %v251_v51  ;;  %v321_v16 = vadd.f32 %v316_v15, %v291_v50  ;;  %v256_v51 = vmul.f32 %v929_v22, %v1050_v42  ;;  %v290_v22 = vmul.f32 %v939_v24, %v1004_v45 }
  0xb1   :  { %398 = vst [vmem:[#allocation8 + $0x18] sm:$0xff] %v250_v0 }
  0xb2   :  { %408 = vst [vmem:[#allocation8 + $0x68] sm:$0xff] %v321_v16 }
  0xb3   :  { %v239_v17 = vpop.permute.xlu1 %238 }
  0xb4   :  { %v237_v41 = vpop.permute.xlu0 %236  ;;  %v249_v12 = vmul.f32 %v239_v17, %v989_v37 }
  0xb5   :  { %v248_v26 = vmul.f32 %v237_v41, %v1033_v58  ;;  %v309_v46 = vpop.permute.xlu2 %308  ;;  %v259_v41 = vmul.f32 %v941_v25, %v985_v36  ;;  %v293_v25 = vmul.f32 %v951_v27, %v1023_v54 }
  0xb6   :  { %v254_v20 = vadd.f32 %v249_v12, %v224_v61  ;;  %v319_v50 = vmul.f32 %v309_v46, %v989_v37  ;;  %v327_v12 = vmul.f32 %v971_v32, %v1035_v60 }
  0xb7   :  { %v253_v43 = vadd.f32 %v248_v26, %v223_v11 }
  0xb8   :  { %430 = vst [vmem:[#allocation8 + $0x118] sm:$0xff] %v254_v20  ;;  %v324_v18 = vadd.f32 %v319_v50, %v294_v23 }
  0xb9   :  { %422 = vst [vmem:[#allocation8 + $0xd8] sm:$0xff] %v253_v43  ;;  %v360_v43 = vmul.f32 %v983_v35, %v1004_v45 }
  0xba   :  { %432 = vst [vmem:[#allocation8 + $0x128] sm:$0xff] %v324_v18 }
  0xbb   :  { %v270_v0 = vpop.permute.xlu1 %269 }
  0xbc   :  { %v268_v13 = vpop.permute.xlu0 %267  ;;  %v282_v15 = vmul.f32 %v270_v0, %v1042_v62 }
  0xbd   :  { %v281_v29 = vmul.f32 %v268_v13, %v1062_v55  ;;  %v340_v11 = vpop.permute.xlu2 %339 }
  0xbe   :  { %v287_v16 = vadd.f32 %v282_v15, %v257_v19  ;;  %v352_v17 = vmul.f32 %v340_v11, %v1042_v62 }
  0xbf   :  { %v286_v61 = vadd.f32 %v281_v29, %v256_v51  ;;  %v292_v51 = vmul.f32 %v953_v28, %v1035_v60  ;;  %v363_v29 = vmul.f32 %v1002_v44, %v1023_v54  ;;  %v326_v28 = vmul.f32 %v963_v30, %v1050_v42 }
  0xc0   :  { %415 = vst [vmem:[#allocation8 + $0xa0] sm:$0xff] %v287_v16  ;;  %v357_v21 = vadd.f32 %v352_v17, %v327_v12  ;;  %v325_v17 = vmul.f32 %v965_v31, %v1004_v45  ;;  %v329_v31 = vmul.f32 %v975_v33, %v985_v36 }
  0xc1   :  { %407 = vst [vmem:[#allocation8 + $0x60] sm:$0xff] %v286_v61 }
  0xc2   :  { %417 = vst [vmem:[#allocation8 + $0xb0] sm:$0xff] %v357_v21 }
  0xc3   :  { %v301_v26 = vpop.permute.xlu1 %300 }
  0xc4   :  { %v274_v23 = vpop.permute.xlu0 %273  ;;  %v315_v20 = vmul.f32 %v301_v26, %v1014_v49  ;;  %v456_v26 = vmul.f32 %v1021_v53, %v1050_v42 }
  0xc5   :  { %v284_v32 = vmul.f32 %v274_v23, %v989_v37  ;;  %v371_v18 = vpop.permute.xlu2 %370 }
  0xc6   :  { %v320_v46 = vadd.f32 %v315_v20, %v290_v22  ;;  %v385_v19 = vmul.f32 %v371_v18, %v1014_v49 }
  0xc7   :  { %v289_v50 = vadd.f32 %v284_v32, %v259_v41 }
  0xc8   :  { %400 = vst [vmem:[#allocation8 + $0x28] sm:$0xff] %v320_v46  ;;  %v390_v24 = vadd.f32 %v385_v19, %v360_v43  ;;  %v328_v46 = vmul.f32 %v977_v34, %v1023_v54  ;;  %v362_v34 = vmul.f32 %v993_v39, %v1035_v60 }
  0xc9   :  { %431 = vst [vmem:[#allocation8 + $0x120] sm:$0xff] %v289_v50 }
  0xca   :  { %402 = vst [vmem:[#allocation8 + $0x38] sm:$0xff] %v390_v24  ;;  %v459_v24 = vmul.f32 %v1044_v2, %v985_v36 }
  0xcb   :  { %v307_v0 = vpop.permute.xlu1 %306 }
  0xcc   :  { %v305_v13 = vpop.permute.xlu0 %304  ;;  %v318_v15 = vmul.f32 %v307_v0, %v1033_v58 }
  0xcd   :  { %v317_v35 = vmul.f32 %v305_v13, %v1042_v62  ;;  %v377_v61 = vpop.permute.xlu2 %376 }
  0xce   :  { %v323_v12 = vadd.f32 %v318_v15, %v293_v25  ;;  %v388_v11 = vmul.f32 %v377_v61, %v1033_v58  ;;  %v361_v15 = vmul.f32 %v995_v40, %v1050_v42  ;;  %v455_v40 = vmul.f32 %v1010_v47, %v1004_v45 }
  0xcf   :  { %v322_v16 = vadd.f32 %v317_v35, %v292_v51 }
  0xd0   :  { %424 = vst [vmem:[#allocation8 + $0xe8] sm:$0xff] %v323_v12  ;;  %v393_v27 = vadd.f32 %v388_v11, %v363_v29 }
  0xd1   :  { %416 = vst [vmem:[#allocation8 + $0xa8] sm:$0xff] %v322_v16  ;;  %v492_v16 = vmul.f32 %v1069_v63, %v1035_v60 }
  0xd2   :  { %426 = vst [vmem:[#allocation8 + $0xf8] sm:$0xff] %v393_v27 }
  0xd3   :  { %v338_v21 = vpop.permute.xlu1 %337 }
  0xd4   :  { %v336_v22 = vpop.permute.xlu0 %335  ;;  %v351_v41 = vmul.f32 %v338_v21, %v1062_v55 }
  0xd5   :  { %v350_v44 = vmul.f32 %v336_v22, %v1014_v49  ;;  %v468_v32 = vpop.permute.xlu2 %467 }
  0xd6   :  { %v356_v23 = vadd.f32 %v351_v41, %v326_v28  ;;  %v481_v43 = vmul.f32 %v468_v32, %v1062_v55  ;;  %v458_v32 = vmul.f32 %v1029_v56, %v1023_v54 }
  0xd7   :  { %v355_v20 = vadd.f32 %v350_v44, %v325_v17  ;;  %v364_v17 = vmul.f32 %v1012_v48, %v985_v36  ;;  %v525_v44 = vmul.f32 %v1090_v38, %v1004_v45 }
  0xd8   :  { %409 = vst [vmem:[#allocation8 + $0x70] sm:$0xff] %v356_v23  ;;  %v486_v30 = vadd.f32 %v481_v43, %v456_v26  ;;  %v457_v43 = vmul.f32 %v1031_v57, %v1035_v60 }
  0xd9   :  { %401 = vst [vmem:[#allocation8 + $0x30] sm:$0xff] %v355_v20 }
  0xda   :  { %599 = vst [vmem:[#allocation9 + $0x20] sm:$0xff] %v486_v30 }
  0xdb   :  { %v344_v50 = vpop.permute.xlu1 %343 }
  0xdc   :  { %v342_v18 = vpop.permute.xlu0 %341  ;;  %v354_v19 = vmul.f32 %v344_v50, %v989_v37  ;;  %v528_v50 = vmul.f32 %v1111_v8, %v1023_v54 }
  0xdd   :  { %v353_v53 = vmul.f32 %v342_v18, %v1033_v58  ;;  %v474_v0 = vpop.permute.xlu2 %473 }
  0xde   :  { %v359_v25 = vadd.f32 %v354_v19, %v329_v31  ;;  %v484_v13 = vmul.f32 %v474_v0, %v989_v37 }
  0xdf   :  { %v358_v51 = vadd.f32 %v353_v53, %v328_v46 }
  0xe0   :  { %433 = vst [vmem:[#allocation8 + $0x130] sm:$0xff] %v359_v25  ;;  %v489_v33 = vadd.f32 %v484_v13, %v459_v24  ;;  %v491_v24 = vmul.f32 %v1058_v52, %v1050_v42  ;;  %v490_v25 = vmul.f32 %v1060_v1, %v1004_v45  ;;  %v494_v1 = vmul.f32 %v1081_v59, %v985_v36 }
  0xe1   :  { %425 = vst [vmem:[#allocation8 + $0xf0] sm:$0xff] %v358_v51 }
  0xe2   :  { %611 = vst [vmem:[#allocation9 + $0x80] sm:$0xff] %v489_v33  ;;  %v561_v33 = vmul.f32 %v1132_v5, %v1050_v42 }
  0xe3   :  { %v375_v35 = vpop.permute.xlu1 %374 }
  0xe4   :  { %v373_v29 = vpop.permute.xlu0 %372  ;;  %v387_v12 = vmul.f32 %v375_v35, %v1042_v62 }
  0xe5   :  { %v386_v2 = vmul.f32 %v373_v29, %v1062_v55  ;;  %v505_v27 = vpop.permute.xlu2 %504 }
  0xe6   :  { %v392_v61 = vadd.f32 %v387_v12, %v362_v34  ;;  %v517_v28 = vmul.f32 %v505_v27, %v1042_v62  ;;  %v493_v12 = vmul.f32 %v1083_v3, %v1023_v54  ;;  %v527_v3 = vmul.f32 %v1102_v4, %v1035_v60 }
  0xe7   :  { %v391_v11 = vadd.f32 %v386_v2, %v361_v15  ;;  %v529_v4 = vmul.f32 %v1125_v9, %v985_v36 }
  0xe8   :  { %418 = vst [vmem:[#allocation8 + $0xb8] sm:$0xff] %v392_v61  ;;  %v522_v39 = vadd.f32 %v517_v28, %v492_v16 }
  0xe9   :  { %410 = vst [vmem:[#allocation8 + $0x78] sm:$0xff] %v391_v11  ;;  %v564_v11 = vmul.f32 %v1153_v14, %v985_v36 }
  0xea   :  { %604 = vst [vmem:[#allocation9 + $0x48] sm:$0xff] %v522_v39 }
  0xeb   :  { %v466_v21 = vpop.permute.xlu1 %465 }
  0xec   :  { %v379_v22 = vpop.permute.xlu0 %378  ;;  %v480_v41 = vmul.f32 %v466_v21, %v1014_v49 }
  0xed   :  { %v389_v63 = vmul.f32 %v379_v22, %v989_v37  ;;  %v536_v23 = vpop.permute.xlu2 %535 }
  0xee   :  { %v485_v47 = vadd.f32 %v480_v41, %v455_v40  ;;  %v550_v48 = vmul.f32 %v536_v23, %v1014_v49 }
  0xef   :  { %v394_v26 = vadd.f32 %v389_v63, %v364_v17  ;;  %v526_v17 = vmul.f32 %v1104_v6, %v1050_v42 }
  0xf0   :  { %595 = vst [vmem:[#allocation9] sm:$0xff] %v485_v47  ;;  %v555_v20 = vadd.f32 %v550_v48, %v525_v44  ;;  %v560_v47 = vmul.f32 %v1123_v7, %v1004_v45 }
  0xf1   :  { %434 = vst [vmem:[#allocation8 + $0x138] sm:$0xff] %v394_v26 }
  0xf2   :  { %627 = dma.vmem_to_hbm [thread:$0]  %s620_s8, 5120, %s622_s11, [#allocation4], %s793_s23, %s793_s23, %s794_s24   ;;  %597 = vst [vmem:[#allocation9 + $0x10] sm:$0xff] %v555_v20 }
  0xf3   :  { %v472_v38 = vpop.permute.xlu1 %471 }
  0xf4   :  { %v470_v30 = vpop.permute.xlu0 %469  ;;  %v483_v31 = vmul.f32 %v472_v38, %v1033_v58 }
  0xf5   :  { %v482_v46 = vmul.f32 %v470_v30, %v1042_v62  ;;  %v542_v56 = vpop.permute.xlu2 %541 }
  0xf6   :  { %v488_v18 = vadd.f32 %v483_v31, %v458_v32  ;;  %v553_v53 = vmul.f32 %v542_v56, %v1033_v58  ;;  %v1302_v32 = vld [vmem:[#allocation15_spill] sm:$0xff] }
  0xf7   :  { %v487_v19 = vadd.f32 %v482_v46, %v457_v43  ;;  %v562_v43 = vmul.f32 %v1302_v32, %v1035_v60 }
  0xf8   :  { %607 = vst [vmem:[#allocation9 + $0x60] sm:$0xff] %v488_v18  ;;  %v558_v57 = vadd.f32 %v553_v53, %v528_v50 }
  0xf9   :  { %603 = vst [vmem:[#allocation9 + $0x40] sm:$0xff] %v487_v19 }
  0xfa   :  { %609 = vst [vmem:[#allocation9 + $0x70] sm:$0xff] %v558_v57 }
  0xfb   :  { %v503_v51 = vpop.permute.xlu1 %502 }
  0xfc   :  { %v501_v0 = vpop.permute.xlu0 %500  ;;  %v516_v13 = vmul.f32 %v503_v51, %v1062_v55 }
  0xfd   :  { %v515_v8 = vmul.f32 %v501_v0, %v1014_v49  ;;  %v573_v35 = vpop.permute.xlu2 %572 }
  0xfe   :  { %v521_v34 = vadd.f32 %v516_v13, %v491_v24  ;;  %v586_v29 = vmul.f32 %v573_v35, %v1062_v55 }
  0xff   :  { %v520_v15 = vadd.f32 %v515_v8, %v490_v25 }
 0x100   :  { %600 = vst [vmem:[#allocation9 + $0x28] sm:$0xff] %v521_v34  ;;  %v591_v52 = vadd.f32 %v586_v29, %v561_v33 }
 0x101   :  { %596 = vst [vmem:[#allocation9 + $0x8] sm:$0xff] %v520_v15 }
 0x102   :  { %602 = vst [vmem:[#allocation9 + $0x38] sm:$0xff] %v591_v52 }
 0x103   :  { %v509_v2 = vpop.permute.xlu1 %508 }
 0x104   :  { %v507_v16 = vpop.permute.xlu0 %506  ;;  %v519_v61 = vmul.f32 %v509_v2, %v989_v37 }
 0x105   :  { %v518_v5 = vmul.f32 %v507_v16, %v1033_v58  ;;  %v579_v39 = vpop.permute.xlu2 %578 }
 0x106   :  { %v524_v27 = vadd.f32 %v519_v61, %v494_v1  ;;  %v589_v40 = vmul.f32 %v579_v39, %v989_v37 }
 0x107   :  { %v523_v28 = vadd.f32 %v518_v5, %v493_v12 }
 0x108   :  { %612 = vst [vmem:[#allocation9 + $0x88] sm:$0xff] %v524_v27  ;;  %v594_v59 = vadd.f32 %v589_v40, %v564_v11 }
 0x109   :  { %608 = vst [vmem:[#allocation9 + $0x68] sm:$0xff] %v523_v28 }
 0x10a   :  { %614 = vst [vmem:[#allocation9 + $0x98] sm:$0xff] %v594_v59 }
 0x10b   :  { %v540_v21 = vpop.permute.xlu1 %539 }
 0x10c   :  { %v538_v22 = vpop.permute.xlu0 %537  ;;  %v552_v41 = vmul.f32 %v540_v21, %v1042_v62 }
 0x10d   :  { %v551_v14 = vmul.f32 %v538_v22, %v1062_v55  ;;  %v563_v55 = vmul.f32 %v1144_v10, %v1023_v54 }
 0x10e   :  { %v557_v63 = vadd.f32 %v552_v41, %v527_v3 }
 0x10f   :  { %v556_v44 = vadd.f32 %v551_v14, %v526_v17 }
 0x110   :  { %605 = vst [vmem:[#allocation9 + $0x50] sm:$0xff] %v557_v63 }
 0x111   :  { %601 = vst [vmem:[#allocation9 + $0x30] sm:$0xff] %v556_v44 }
 0x113   :  { %v571_v26 = vpop.permute.xlu1 %570 }
 0x114   :  { %v544_v23 = vpop.permute.xlu0 %543  ;;  %v585_v42 = vmul.f32 %v571_v26, %v1014_v49 }
 0x115   :  { %v554_v6 = vmul.f32 %v544_v23, %v989_v37 }
 0x116   :  { %v590_v48 = vadd.f32 %v585_v42, %v560_v47 }
 0x117   :  { %v559_v20 = vadd.f32 %v554_v6, %v529_v4 }
 0x118   :  { %598 = vst [vmem:[#allocation9 + $0x18] sm:$0xff] %v590_v48 }
 0x119   :  { %613 = vst [vmem:[#allocation9 + $0x90] sm:$0xff] %v559_v20 }
 0x11b   :  { %v577_v45 = vpop.permute.xlu1 %576 }
 0x11c   :  { %v575_v7 = vpop.permute.xlu0 %574  ;;  %v588_v36 = vmul.f32 %v577_v45, %v1033_v58 }
 0x11d   :  { %v587_v9 = vmul.f32 %v575_v7, %v1042_v62 }
 0x11e   :  { %v593_v37 = vadd.f32 %v588_v36, %v563_v55 }
 0x11f   :  { %v592_v49 = vadd.f32 %v587_v9, %v562_v43 }
 0x120   :  { %610 = vst [vmem:[#allocation9 + $0x78] sm:$0xff] %v593_v37 }
 0x121   :  { %606 = vst [vmem:[#allocation9 + $0x58] sm:$0xff] %v592_v49 }
 0x122   :  { %640 = dma.vmem_to_hbm [thread:$0]  %s633_s12, 2560, %s635_s15, [#allocation10], %s799_s6, %s799_s6, %s800_s7  }
 0x123   :  { %788 = dma.done.wait [#allocation4], 5120  }
 0x124   :  { %789 = vsyncadd [#allocation4], 4294962176 }
 0x125   :  { %790 = dma.done.wait [#allocation10], 2560  }
 0x126   :  { %791 = vsyncadd [#allocation10], 4294964736 }
 0x127   :  { %649 = vsyncpa [#allocation3], 1 }
 0x128   :  { %650 = vsyncpa [#allocation6], 1 }
 0x129   :  { %651 = vsyncpa [#allocation4], 1 }
 0x12a   :  { %652 = vsyncpa [#allocation10], 1 }

</bundles_post_ra>
